<compile_context>
chip_gen: v7x
topology: tpu7x:2x2x1
jax: 0.10.0
libtpu: 0.0.40
codegen_flags: <defaults>
</compile_context>

<pallas_src>
import math
import functools

import jax
import jax.numpy as jnp
from jax import lax
from jax.experimental import pallas as pl
from jax.experimental.pallas import tpu as pltpu


# ----------------------------------------------------------------------------
# Buffer construction (mirrors nn.Module.__init__; plain JAX glue)
# ----------------------------------------------------------------------------
def make_positional_encoding_table(d_model: int, max_len: int = 64) -> jnp.ndarray:
    position = jnp.arange(max_len, dtype=jnp.float32)[:, None]              # [max_len, 1]
    div_term = jnp.exp(
        jnp.arange(0, d_model, 2, dtype=jnp.float32) * (-math.log(10000.0) / d_model)
    )                                                                        # [d_model//2]
    pe = jnp.zeros((max_len, 1, d_model), dtype=jnp.float32)
    pe = pe.at[:, 0, 0::2].set(jnp.sin(position * div_term))
    pe = pe.at[:, 0, 1::2].set(jnp.cos(position * div_term))
    return pe                                                                # [max_len, 1, d_model]


# ----------------------------------------------------------------------------
# In-kernel helpers
# ----------------------------------------------------------------------------
def _pe_broadcast(pe_tile, batch):
    # (ts, D) -> (ts, B*D): value at [:, b*D + d] == pe_tile[:, d], matching the
    # row-major flatten of x's trailing (B, D) dims.  Lane-dim concat lowers to
    # whole-vreg copies when D % 128 == 0 and to small lane shifts otherwise;
    # either way it is XLU/VPU filler in a memory-bound kernel.
    if batch == 1:
        return pe_tile
    return jnp.concatenate([pe_tile] * batch, axis=-1)


# ----------------------------------------------------------------------------
# Pallas kernels
# ----------------------------------------------------------------------------
def _posenc_eval_kernel(x_ref, pe_ref, o_ref, *, batch):
    # x tile: (ts, B*D), pe tile: (ts, D) broadcast over batch in-register.
    o_ref[...] = x_ref[...] + _pe_broadcast(pe_ref[...], batch)


def _posenc_train_kernel(seed_ref, x_ref, pe_ref, o_ref, *, batch, keep_thresh, scale):
    ts, bd = x_ref.shape
    y = x_ref[...] + _pe_broadcast(pe_ref[...], batch)

    # --- stateless counter-based dropout mask (trimmed) ---------------------
    # Scalar path, once per tile (uint32 so the flat index never wraps via
    # signed int32 even when S*B*D > 2**31; mask period is 2**32 elements).
    base = (pl.program_id(0) * ts).astype(jnp.uint32) * jnp.uint32(bd)
    seed_mix = (seed_ref[0].astype(jnp.uint32) ^ jnp.uint32(0xA5A5B6D2)) * jnp.uint32(0x9E3779B9)

    # Vector path: 2 iotas + ~9 integer ops / element (was 3 iotas + ~20 ops).
    r = lax.broadcasted_iota(jnp.int32, (ts, bd), 0).astype(jnp.uint32)
    c = lax.broadcasted_iota(jnp.int32, (ts, bd), 1).astype(jnp.uint32)
    s = (r * jnp.uint32(bd) + c + base) ^ seed_mix       # global index keyed, seed XORed in
    s = (s ^ (s >> 16)) * jnp.uint32(0x9E3779B9)          # one 32-bit multiply ...
    s = s ^ (s >> 13)                                     # ... + two xorshifts
    keep = s >= jnp.uint32(keep_thresh)                   # drop iff hash < p * 2**32

    # TODO(synk): for bf16 inputs, hash once per element *pair* and derive two
    # keep bits from the high/low 16 bits to halve integer-hash work.
    scale_c = jnp.asarray(scale, dtype=y.dtype)
    o_ref[...] = jnp.where(keep, y * scale_c, jnp.zeros_like(y))


# ----------------------------------------------------------------------------
# Wrapper
# ----------------------------------------------------------------------------
def positional_encoding_forward(
    x: jnp.ndarray,
    pe: jnp.ndarray,
    *,
    dropout_p: float = 0.1,
    training: bool = False,
    seed: int = 0,
    vmem_block_bytes: int = 8 * 1024 * 1024,
    alias_output_to_x: bool = False,
) -> jnp.ndarray:
    """x: [S, B, D], pe: [max_len, 1, D]. Returns dropout(x + pe[:S])."""
    S, B, D = x.shape
    BD = B * D

    # Layout glue (free): merge (B, D) into the lane axis; slice + cast tiny pe.
    x2 = x.reshape(S, BD)
    pe2 = pe[:S].reshape(S, D).astype(x.dtype)

    itemsize = jnp.dtype(x.dtype).itemsize
    row_bytes = BD * itemsize
    sub = 8 * max(1, 4 // itemsize)            # sublane granularity for this dtype

    if S <= sub:
        ts = S                                 # single full-extent block (layout-legal)
    else:
        ts = max(1, vmem_block_bytes // max(1, row_bytes))
        ts = min(ts, pl.cdiv(S, 2))            # >= 2 grid steps so both v7x TCs get work
        ts = max(sub, (ts // sub) * sub)       # sublane-aligned rows per block
        ts = min(ts, S)
    grid = (pl.cdiv(S, ts),)

    # VMEM budget: x + out blocks double-buffered, plus small pe blocks + slack.
    # Floor at the 16 MiB v5e scoped default, cap at 48 MiB for v7x's 64 MiB/TC.
    block_bytes = ts * row_bytes
    pe_block_bytes = ts * D * itemsize
    vmem_limit = int(min(max(4 * block_bytes + 2 * pe_block_bytes + (4 << 20), 16 << 20), 48 << 20))

    # Last block dim equals the full array dim (B*D) -> always layout-legal and
    # lane-dense for B*D >= 128; second-to-last is sublane-aligned (or == S).
    x_spec = pl.BlockSpec((ts, BD), lambda i: (i, 0))
    pe_spec = pl.BlockSpec((ts, D), lambda i: (i, 0))
    out_spec = pl.BlockSpec((ts, BD), lambda i: (i, 0))
    out_shape = jax.ShapeDtypeStruct((S, BD), x.dtype)
    cparams = pltpu.CompilerParams(
        dimension_semantics=("parallel",),
        vmem_limit_bytes=vmem_limit,
    )

    if (not training) or dropout_p == 0.0:
        y2 = pl.pallas_call(
            functools.partial(_posenc_eval_kernel, batch=B),
            out_shape=out_shape,
            grid=grid,
            in_specs=[x_spec, pe_spec],
            out_specs=out_spec,
            compiler_params=cparams,
            input_output_aliases=({0: 0} if alias_output_to_x else {}),
        )(x2, pe2)
        return y2.reshape(S, B, D)

    keep_thresh = min(int(round(float(dropout_p) * 4294967296.0)), 0xFFFFFFFF)
    scale = 1.0 / (1.0 - float(dropout_p))
    kernel = functools.partial(
        _posenc_train_kernel, batch=B, keep_thresh=keep_thresh, scale=scale
    )
    seed_arr = jnp.asarray([seed], dtype=jnp.int32)
    seed_spec = pl.BlockSpec(memory_space=pltpu.MemorySpace.SMEM)   # scalar, whole array

    y2 = pl.pallas_call(
        kernel,
        out_shape=out_shape,
        grid=grid,
        in_specs=[seed_spec, x_spec, pe_spec],
        out_specs=out_spec,
        compiler_params=cparams,
        input_output_aliases=({1: 0} if alias_output_to_x else {}),
    )(seed_arr, x2, pe2)
    return y2.reshape(S, B, D)


# ----------------------------------------------------------------------------
# Demo / self-test
# ----------------------------------------------------------------------------
if __name__ == "__main__":
    d_model = 32
    max_len = 64
    seq_len = 8
    batch = 2

    key = jax.random.PRNGKey(0)
    x = jax.random.normal(key, (seq_len, batch, d_model), dtype=jnp.float32)
    pe = make_positional_encoding_table(d_model, max_len)

    # Eval mode: dropout is identity -> exact match against JAX reference.
    y_eval = jax.block_until_ready(
        positional_encoding_forward(x, pe, dropout_p=0.1, training=False)
    )
    ref = x + pe[:seq_len]
    assert y_eval.shape == (seq_len, batch, d_model)
    assert jnp.allclose(y_eval, ref, atol=1e-6), "eval-mode mismatch"

    # Training mode: inverted dropout. Kept entries must equal ref / (1 - p).
    p = 0.1
    y_train = jax.block_until_ready(
        positional_encoding_forward(x, pe, dropout_p=p, training=True, seed=1234)
    )
    assert y_train.shape == (seq_len, batch, d_model)
    kept = y_train != 0            # (misses exact zeros of x+pe; fine for a self-test)
    scaled_ref = ref / (1.0 - p)
    assert bool(kept.any()), "dropout dropped everything"
    assert jnp.allclose(
        jnp.where(kept, y_train, 0.0), jnp.where(kept, scaled_ref, 0.0), atol=1e-5
    ), "train-mode kept values mismatch"
    drop_frac = 1.0 - float(kept.astype(jnp.float32).mean())
    assert drop_frac < 0.5, f"dropout rate implausible: {drop_frac}"

    # Larger lane-dense case: multi-step grid, D % 128 == 0, both paths.
    S2, B2, D2 = 64, 4, 128
    xl = jax.random.normal(jax.random.PRNGKey(1), (S2, B2, D2), dtype=jnp.float32)
    pel = make_positional_encoding_table(D2, max_len)
    y_l = jax.block_until_ready(positional_encoding_forward(xl, pel, training=False))
    ref_l = xl + pel[:S2]
    assert jnp.allclose(y_l, ref_l, atol=1e-6), "eval-mode mismatch (large)"

    y_lt = jax.block_until_ready(
        positional_encoding_forward(xl, pel, dropout_p=p, training=True, seed=7)
    )
    kept_l = y_lt != 0
    assert jnp.allclose(
        jnp.where(kept_l, y_lt, 0.0),
        jnp.where(kept_l, ref_l / (1.0 - p), 0.0),
        atol=1e-5,
    ), "train-mode kept values mismatch (large)"
    df_l = 1.0 - float(kept_l.astype(jnp.float32).mean())
    assert 0.0 < df_l < 0.4, f"dropout rate implausible (large): {df_l}"

    print("KERNEL_OK")
</pallas_src>

<mosaic_0001>
module attributes {stable_mosaic.version = 11 : i64} {
  func.func @_posenc_eval_kernel(%arg0: i32, %arg1: memref<8x64xf32, #tpu.memory_space<vmem>>, %arg2: memref<8x32xf32, #tpu.memory_space<vmem>>, %arg3: memref<8x64xf32, #tpu.memory_space<vmem>>) attributes {dimension_semantics = [#tpu.dimension_semantics<parallel>], iteration_bounds = array<i64: 1>, scalar_prefetch = 0 : i64, scratch_operands = 0 : i64, tpu.core_type = #tpu.core_type<tc>, window_params = [{transform_indices = @transform_0, window_bounds = array<i64: 8, 64>}, {transform_indices = @transform_1, window_bounds = array<i64: 8, 32>}, {transform_indices = @transform_2, window_bounds = array<i64: 8, 64>}]} {
    %c0 = arith.constant 0 : index
    %c0_0 = arith.constant 0 : index
    %0 = vector.load %arg1[%c0, %c0_0] : memref<8x64xf32, #tpu.memory_space<vmem>>, vector<8x64xf32>
    %c0_1 = arith.constant 0 : index
    %c0_2 = arith.constant 0 : index
    %1 = vector.load %arg2[%c0_1, %c0_2] : memref<8x32xf32, #tpu.memory_space<vmem>>, vector<8x32xf32>
    %2 = tpu.concatenate %1, %1 in 1 : vector<8x32xf32>, vector<8x32xf32> -> vector<8x64xf32>
    %3 = arith.addf %0, %2 : vector<8x64xf32>
    %c0_3 = arith.constant 0 : index
    %c0_4 = arith.constant 0 : index
    %4 = vector.load %arg3[%c0_3, %c0_4] : memref<8x64xf32, #tpu.memory_space<vmem>>, vector<8x64xf32>
    tpu.vector_store %arg3[%c0_3, %c0_4], %3 {strides = array<i32>} : memref<8x64xf32, #tpu.memory_space<vmem>>, vector<8x64xf32>,
    return
  }
  func.func @transform_0(%arg0: i32) -> (i32, i32) {
    %c0_i32 = arith.constant 0 : i32
    %c0_i32_0 = arith.constant 0 : i32
    return %arg0, %c0_i32 : i32, i32
  }
  func.func @transform_1(%arg0: i32) -> (i32, i32) {
    %c0_i32 = arith.constant 0 : i32
    %c0_i32_0 = arith.constant 0 : i32
    return %arg0, %c0_i32 : i32, i32
  }
  func.func @transform_2(%arg0: i32) -> (i32, i32) {
    %c0_i32 = arith.constant 0 : i32
    %c0_i32_0 = arith.constant 0 : i32
    return %arg0, %c0_i32 : i32, i32
  }
}

</mosaic_0001>

<bundles_post_ra>
// kernel: tpu_custom_call.1
= control target key start
LH: loop header
LB: loop body
LE: loop exit
PB: predicated region body
PF: predicated region fallthrough
CT: control target
= control target key end

     0   :  { %7 = vsyncpa [#allocation3], 0  ;;  %s194_s0 = inlined_call_operand.hbm [shape: f32[8,64], index: 0, kind: input, shape index: {}]   ;;  %s195_s1 = inlined_call_operand.hbm [shape: f32[8,32], index: 1, kind: input, shape index: {}]   ;;  %s196_s2 = inlined_call_operand.hbm [shape: f32[8,64], index: 2, kind: output, shape index: {}]  }
   0x1   :  { %8 = vsyncpa [#allocation6], 0 }
   0x2   :  { %9 = vsyncpa [#allocation4], 0  ;;  %s139_s9 = smov [#allocation2]   ;;  %s140_s11 = smov [#allocation5]  }
   0x3   :  { %s16_s10 = sshll.u32 %s139_s9, 4  ;;  %s26_s12 = sshll.u32 %s140_s11, 4  ;;  %s17_s10 = int_to_ptr.vmem [resolvable:$true] %s16_s10  ;;  %s27_s12 = int_to_ptr.vmem [resolvable:$true] %s26_s12 }
   0x4   :  { %s67_s15 = scalar_lea.hbm %s194_s0, 128 }
   0x5   :  { %p68_p0 = scmp.ne.s32.totalorder %s194_s0, %s67_s15  ;;  %p71_p1 = scmp.lt.u32.totalorder %s67_s15, %s194_s0 }
   0x7   :  { %p73_p2 = pnand %p71_p1, %p68_p0 }
   0x9   :  { %76 = shalt.err (!%p73_p2)
}
   0xa   :  { %s77_s20 = scalar_lea.vmem %s17_s10, 128  ;;  %p82_p4 = scmp.lt.s32.totalorder %s17_s10, %s17_s10 }
   0xb   :  { %p78_p3 = scmp.ne.s32.totalorder %s17_s10, %s77_s20  ;;  %p83_p5 = scmp.lt.s32.totalorder %s77_s20, %s77_s20 }
   0xd   :  { %p84_p6 = por %p83_p5, %p82_p4 }
   0xf   :  { %p85_p7 = pnand %p84_p6, %p78_p3 }
  0x11   :  { %88 = shalt.err (!%p85_p7)
}
  0x12   :  { %19 = dma.hbm_to_vmem [thread:$0]  %s194_s0, 128, %s17_s10, [#allocation3]  }
  0x13   :  { %s89_s25 = scalar_lea.hbm %s195_s1, 128 }
  0x14   :  { %p90_p8 = scmp.ne.s32.totalorder %s195_s1, %s89_s25  ;;  %p93_p9 = scmp.lt.u32.totalorder %s89_s25, %s195_s1 }
  0x16   :  { %p95_p10 = pnand %p93_p9, %p90_p8 }
  0x18   :  { %98 = shalt.err (!%p95_p10)
}
  0x19   :  { %s99_s30 = scalar_lea.vmem %s27_s12, 128  ;;  %p104_p12 = scmp.lt.s32.totalorder %s27_s12, %s27_s12 }
  0x1a   :  { %p100_p11 = scmp.ne.s32.totalorder %s27_s12, %s99_s30  ;;  %p105_p13 = scmp.lt.s32.totalorder %s99_s30, %s99_s30 }
  0x1c   :  { %p106_p0 = por %p105_p13, %p104_p12 }
  0x1e   :  { %p107_p1 = pnand %p106_p0, %p100_p11 }
  0x20   :  { %110 = shalt.err (!%p107_p1)
}
  0x21   :  { %29 = dma.hbm_to_vmem [thread:$0]  %s195_s1, 128, %s27_s12, [#allocation6]  }
  0x22   :  { %133 = dma.done.wait [#allocation3], 128  }
  0x23   :  { %134 = vsyncadd [#allocation3], 4294967168 }
  0x24   :  { %135 = dma.done.wait [#allocation6], 128  }
  0x25   :  { %136 = vsyncadd [#allocation6], 4294967168  ;;  %v37_v0 = vld [vmem:[#allocation5] sm:$0xff]  ;;  %s141_s4 = smov 32   ;;  %vm42_vm0 = vcmask 261120   ;;  %v36_v1 = vld [vmem:[#allocation2] sm:$0xff] }
  0x26   :  { %39 = vrot.lane.b32.xlu0 %v37_v0, %s141_s4  ;;  %s142_s5 = smov [#allocation7]   ;;  %vm45_vm1 = vcmask 523264  }
  0x27   :  { %s53_s6 = sshll.u32 %s142_s5, 4  ;;  %s54_s6 = int_to_ptr.vmem [resolvable:$true] %s53_s6 }
  0x28   :  { %s111_s7 = scalar_lea.vmem %s54_s6, 128  ;;  %p116_p3 = scmp.lt.s32.totalorder %s54_s6, %s54_s6 }
  0x29   :  { %p112_p2 = scmp.ne.s32.totalorder %s54_s6, %s111_s7  ;;  %p117_p4 = scmp.lt.s32.totalorder %s111_s7, %s111_s7 }
  0x2b   :  { %p118_p5 = por %p117_p4, %p116_p3 }
  0x2d   :  { %p119_p6 = pnand %p118_p5, %p112_p2 }
  0x98   :  { %v40_v2 = vpop.permute.xlu0 %39 }
  0x99   :  { %v43_v3 = vsel %vm42_vm0, %v37_v0, %v40_v2 }
  0x9a   :  { %v44_v4 = vadd.f32 %v43_v3, %v36_v1 }
  0x9c   :  { %46 = vst.msk [vmem:[#allocation7] sm:$0xff] %vm45_vm1, %v44_v4 }
  0x9d   :  { %122 = shalt.err (!%p119_p6)
}
  0x9e   :  { %s123_s9 = scalar_lea.hbm %s196_s2, 128 }
  0x9f   :  { %p124_p7 = scmp.ne.s32.totalorder %s196_s2, %s123_s9  ;;  %p127_p8 = scmp.lt.u32.totalorder %s123_s9, %s196_s2 }
  0xa1   :  { %p129_p9 = pnand %p127_p8, %p124_p7 }
  0xa3   :  { %132 = shalt.err (!%p129_p9)
}
  0xa4   :  { %56 = dma.vmem_to_hbm [thread:$0]  %s54_s6, 128, %s196_s2, [#allocation4]  }
  0xa5   :  { %137 = dma.done.wait [#allocation4], 128  }
  0xa6   :  { %138 = vsyncadd [#allocation4], 4294967168 }
  0xa7   :  { %60 = vsyncpa [#allocation3], 1 }
  0xa8   :  { %61 = vsyncpa [#allocation6], 1 }
  0xa9   :  { %62 = vsyncpa [#allocation4], 1 }

</bundles_post_ra>
